<compile_context>
chip_gen: v7x
topology: tpu7x:2x2x1
jax: 0.10.0
libtpu: 0.0.40
codegen_flags: <defaults>
</compile_context>

<pallas_src>
import jax
import jax.numpy as jnp
from jax.experimental import pallas as pl
from jax.experimental.pallas import tpu as pltpu


def relu_conv1x1_kernel(x_ref, w_ref, o_ref):
    # x_ref: (1, C_in, H*W)  f32 -- one batch element, native channel-major layout
    # w_ref: (C_out, C_in)   f32 -- resident across grid steps
    # o_ref: (1, C_out, H*W) f32
    x = jnp.maximum(x_ref[0], 0.0)             # ReLU in f32 (no bf16 VALU on v5e)
    x_bf16 = x.astype(jnp.bfloat16)            # bf16 MXU operands, f32 accumulate
    w_bf16 = w_ref[...].astype(jnp.bfloat16)   # in-kernel cast: no extra XLA convert launch
    o_ref[0] = jnp.dot(w_bf16, x_bf16, preferred_element_type=jnp.float32)


def relu_conv2d_1x1(x_nchw, weight_oihw):
    """ReLU followed by a bias-free 1x1 conv (stride 1); PyTorch `M` semantics."""
    N, C, H, W = x_nchw.shape
    C_out = weight_oihw.shape[0]
    assert weight_oihw.shape == (C_out, C, 1, 1)
    HW = H * W

    # Free reshapes only -- no transposes or converts on the wrapper side.
    x3 = x_nchw.reshape(N, C, HW)
    w_mat = weight_oihw.reshape(C_out, C)

    flops = 2 * N * HW * C * C_out
    bytes_accessed = (
        N * C * HW * 4          # f32 activations in
        + C_out * C * 4         # f32 weight in
        + N * C_out * HW * 4    # f32 output
    )

    out3 = pl.pallas_call(
        relu_conv1x1_kernel,
        out_shape=jax.ShapeDtypeStruct((N, C_out, HW), jnp.float32),
        grid=(N,),
        in_specs=[
            pl.BlockSpec((1, C, HW), lambda n: (n, 0, 0)),
            pl.BlockSpec((C_out, C), lambda n: (0, 0)),   # weight stays resident
        ],
        out_specs=pl.BlockSpec((1, C_out, HW), lambda n: (n, 0, 0)),
        compiler_params=pltpu.CompilerParams(
            dimension_semantics=("parallel",),
        ),
        cost_estimate=pl.CostEstimate(
            flops=flops, transcendentals=0, bytes_accessed=bytes_accessed
        ),
    )(x3, w_mat)

    # Free reshape back to NCHW.
    return out3.reshape(N, C_out, H, W)


if __name__ == "__main__":
    key = jax.random.PRNGKey(0)
    kx, kw = jax.random.split(key)

    # Shapes implied by the module: input [1, 992, 7, 7], conv 992 -> 128, 1x1.
    N, C_in, H, W = 1, 992, 7, 7
    C_out = 128

    x = jax.random.normal(kx, (N, C_in, H, W), dtype=jnp.float32)
    bound = (1.0 / C_in) ** 0.5
    weight = jax.random.uniform(
        kw, (C_out, C_in, 1, 1), dtype=jnp.float32, minval=-bound, maxval=bound
    )

    run = jax.jit(relu_conv2d_1x1)
    out = jax.block_until_ready(run(x, weight))

    # Pure-JAX f32 reference (tolerance accounts for bf16 MXU operands;
    # f32 accumulation over K=992 keeps the error well inside 2e-2).
    ref = jnp.einsum(
        "nchw,oc->nohw", jnp.maximum(x, 0.0), weight.reshape(C_out, C_in)
    )
    assert out.shape == (N, C_out, H, W), out.shape
    assert jnp.allclose(out, ref, atol=2e-2, rtol=2e-2), "mismatch vs reference"

    print("KERNEL_OK")
</pallas_src>

<mosaic_0001>
module attributes {stable_mosaic.version = 11 : i64} {
  func.func @relu_conv1x1_kernel(%arg0: i32, %arg1: memref<1x992x49xf32, #tpu.memory_space<vmem>>, %arg2: memref<128x992xf32, #tpu.memory_space<vmem>>, %arg3: memref<1x128x49xf32, #tpu.memory_space<vmem>>) attributes {dimension_semantics = [#tpu.dimension_semantics<parallel>], iteration_bounds = array<i64: 1>, scalar_prefetch = 0 : i64, scratch_operands = 0 : i64, tpu.core_type = #tpu.core_type<tc>, window_params = [{transform_indices = @transform_0, window_bounds = array<i64: 1, 992, 49>}, {pipeline_mode = #tpu.pipeline_mode<synchronous>, transform_indices = @transform_1, window_bounds = array<i64: 128, 992>}, {transform_indices = @transform_2, window_bounds = array<i64: 1, 128, 49>}]} {
    %c0 = arith.constant 0 : index
    %c0_0 = arith.constant 0 : index
    %c0_1 = arith.constant 0 : index
    %0 = vector.load %arg1[%c0, %c0_0, %c0_1] : memref<1x992x49xf32, #tpu.memory_space<vmem>>, vector<1x992x49xf32>
    %1 = vector.shape_cast %0 : vector<1x992x49xf32> to vector<992x49xf32>
    %cst = arith.constant 0.000000e+00 : f32
    %2 = vector.broadcast %cst : f32 to vector<992x49xf32>
    %3 = arith.maximumf %1, %2 : vector<992x49xf32>
    %4 = arith.truncf %3 : vector<992x49xf32> to vector<992x49xbf16>
    %c0_2 = arith.constant 0 : index
    %c0_3 = arith.constant 0 : index
    %5 = vector.load %arg2[%c0_2, %c0_3] : memref<128x992xf32, #tpu.memory_space<vmem>>, vector<128x992xf32>
    %6 = arith.truncf %5 : vector<128x992xf32> to vector<128x992xbf16>
    %cst_4 = arith.constant dense<0.000000e+00> : vector<128x49xf32>
    %7 = tpu.matmul %6, %4, %cst_4 {dimension_numbers = #tpu.dot_dimension_numbers<[1], [0], [0], [1], [0, 0, 1, 1], [], []>} : vector<128x992xbf16>, vector<992x49xbf16>, vector<128x49xf32> -> vector<128x49xf32>
    %c0_5 = arith.constant 0 : index
    %c0_6 = arith.constant 0 : index
    %c0_7 = arith.constant 0 : index
    %8 = vector.load %arg3[%c0_5, %c0_6, %c0_7] : memref<1x128x49xf32, #tpu.memory_space<vmem>>, vector<1x128x49xf32>
    %9 = vector.shape_cast %8 : vector<1x128x49xf32> to vector<128x49xf32>
    %10 = vector.shape_cast %7 : vector<128x49xf32> to vector<1x128x49xf32>
    tpu.vector_store %arg3[%c0_5, %c0_6, %c0_7], %10 {strides = array<i32>} : memref<1x128x49xf32, #tpu.memory_space<vmem>>, vector<1x128x49xf32>,
    return
  }
  func.func @transform_0(%arg0: i32) -> (i32, i32, i32) {
    %c0_i32 = arith.constant 0 : i32
    %c0_i32_0 = arith.constant 0 : i32
    %c0_i32_1 = arith.constant 0 : i32
    return %arg0, %c0_i32, %c0_i32_0 : i32, i32, i32
  }
  func.func @transform_1(%arg0: i32) -> (i32, i32) {
    %c0_i32 = arith.constant 0 : i32
    %c0_i32_0 = arith.constant 0 : i32
    %c0_i32_1 = arith.constant 0 : i32
    return %c0_i32, %c0_i32_0 : i32, i32
  }
  func.func @transform_2(%arg0: i32) -> (i32, i32, i32) {
    %c0_i32 = arith.constant 0 : i32
    %c0_i32_0 = arith.constant 0 : i32
    %c0_i32_1 = arith.constant 0 : i32
    return %arg0, %c0_i32, %c0_i32_0 : i32, i32, i32
  }
}

</mosaic_0001>

<bundles_post_ra>
// kernel: relu_conv2d_1x1.1
= control target key start
LH: loop header
LB: loop body
LE: loop exit
PB: predicated region body
PF: predicated region fallthrough
CT: control target
= control target key end

     0   :  { %vm514_vm0 = vcmask 785408   ;;  %vm927_vm1 = vcmask 400384   ;;  %s2055_s0 = inlined_call_operand.vmem [shape: f32[1,992,49], index: 0, kind: input, shape index: {}]   ;;  %s2056_s1 = inlined_call_operand.vmem [shape: f32[128,992], index: 1, kind: input, shape index: {}]   ;;  %s2057_s2 = inlined_call_operand.vmem [shape: f32[1,128,49], index: 2, kind: output, shape index: {}]  }
   0x1   :  { %v28_v0 = vld [vmem:[%s2055_s0 + $0x80] sm:$0xff]  ;;  %v29_v1 = vld [vmem:[%s2055_s0 + $0x88] sm:$0xff]  ;;  %v30_v14 = vld [vmem:[%s2055_s0 + $0x90] sm:$0xff] }
   0x2   :  { %v60_v2 = vld [vmem:[%s2055_s0 + $0x180] sm:$0xff]  ;;  %v152_v3 = vmax.f32 %v28_v0, 0.0  ;;  %v153_v4 = vmax.f32 %v29_v1, 0.0  ;;  %v61_v5 = vld [vmem:[%s2055_s0 + $0x188] sm:$0xff]  ;;  %v31_v18 = vld [vmem:[%s2055_s0 + $0x98] sm:$0xff]  ;;  %v154_v19 = vmax.f32 %v30_v14, 0.0 }
   0x3   :  { %v184_v6 = vmax.f32 %v60_v2, 0.0  ;;  %v12_v7 = vld [vmem:[%s2055_s0] sm:$0xff]  ;;  %v13_v8 = vld [vmem:[%s2055_s0 + $0x8] sm:$0xff]  ;;  %v185_v9 = vmax.f32 %v61_v5, 0.0  ;;  %v62_v20 = vld [vmem:[%s2055_s0 + $0x190] sm:$0xff]  ;;  %v155_v24 = vmax.f32 %v31_v18, 0.0 }
   0x4   :  { %v136_v10 = vmax.f32 %v12_v7, 0.0  ;;  %v137_v11 = vmax.f32 %v13_v8, 0.0  ;;  %v44_v12 = vld [vmem:[%s2055_s0 + $0x100] sm:$0xff]  ;;  %v45_v13 = vld [vmem:[%s2055_s0 + $0x108] sm:$0xff]  ;;  %v268_v15 = vpack.c.bf16 %v153_v4, %v152_v3  ;;  %v63_v21 = vld [vmem:[%s2055_s0 + $0x198] sm:$0xff]  ;;  %v186_v25 = vmax.f32 %v62_v20, 0.0 }
   0x5   :  { %v168_v16 = vmax.f32 %v44_v12, 0.0  ;;  %v169_v17 = vmax.f32 %v45_v13, 0.0  ;;  %v284_v22 = vpack.c.bf16 %v185_v9, %v184_v6  ;;  %v14_v26 = vld [vmem:[%s2055_s0 + $0x10] sm:$0xff]  ;;  %v15_v27 = vld [vmem:[%s2055_s0 + $0x18] sm:$0xff]  ;;  %v187_v30 = vmax.f32 %v63_v21, 0.0  ;;  %v32_v34 = vld [vmem:[%s2055_s0 + $0xa0] sm:$0xff] }
   0x6   :  { %v260_v23 = vpack.c.bf16 %v137_v11, %v136_v10  ;;  %v46_v28 = vld [vmem:[%s2055_s0 + $0x110] sm:$0xff]  ;;  %956 = vmatprep.subr.bf16.mxu0 %v268_v15  ;;  %v138_v31 = vmax.f32 %v14_v26, 0.0  ;;  %v139_v32 = vmax.f32 %v15_v27, 0.0  ;;  %v47_v33 = vld [vmem:[%s2055_s0 + $0x118] sm:$0xff]  ;;  %v33_v35 = vld [vmem:[%s2055_s0 + $0xa8] sm:$0xff]  ;;  %v269_v36 = vpack.c.bf16 %v155_v24, %v154_v19 }
   0x7   :  { %v276_v29 = vpack.c.bf16 %v169_v17, %v168_v16  ;;  %1020 = vmatprep.subr.bf16.mxu1 %v284_v22  ;;  %v170_v37 = vmax.f32 %v46_v28, 0.0  ;;  %v171_v38 = vmax.f32 %v47_v33, 0.0  ;;  %v156_v39 = vmax.f32 %v32_v34, 0.0  ;;  %v64_v40 = vld [vmem:[%s2055_s0 + $0x1a0] sm:$0xff]  ;;  %v65_v41 = vld [vmem:[%s2055_s0 + $0x1a8] sm:$0xff]  ;;  %v34_v54 = vld [vmem:[%s2055_s0 + $0xb0] sm:$0xff] }
   0x8   :  { %957 = vmatpush3.bf16.msra.mxu0 %v260_v23  ;;  %v16_v42 = vld [vmem:[%s2055_s0 + $0x20] sm:$0xff]  ;;  %v285_v43 = vpack.c.bf16 %v187_v30, %v186_v25  ;;  %v261_v44 = vpack.c.bf16 %v139_v32, %v138_v31  ;;  %v157_v45 = vmax.f32 %v33_v35, 0.0  ;;  %v188_v46 = vmax.f32 %v64_v40, 0.0  ;;  %v17_v47 = vld [vmem:[%s2055_s0 + $0x28] sm:$0xff]  ;;  %v35_v55 = vld [vmem:[%s2055_s0 + $0xb8] sm:$0xff] }
   0x9   :  { %1021 = vmatpush3.bf16.msra.mxu1 %v276_v29  ;;  %v48_v48 = vld [vmem:[%s2055_s0 + $0x120] sm:$0xff]  ;;  %v49_v49 = vld [vmem:[%s2055_s0 + $0x128] sm:$0xff]  ;;  %958 = vmatprep.subr.bf16.mxu0 %v269_v36  ;;  %v277_v50 = vpack.c.bf16 %v171_v38, %v170_v37  ;;  %v189_v51 = vmax.f32 %v65_v41, 0.0  ;;  %v140_v52 = vmax.f32 %v16_v42, 0.0  ;;  %v141_v53 = vmax.f32 %v17_v47, 0.0  ;;  %v66_v56 = vld [vmem:[%s2055_s0 + $0x1b0] sm:$0xff] }
   0xa   :  { %1022 = vmatprep.subr.bf16.mxu1 %v285_v43  ;;  %v270_v57 = vpack.c.bf16 %v157_v45, %v156_v39  ;;  %v172_v58 = vmax.f32 %v48_v48, 0.0  ;;  %v173_v59 = vmax.f32 %v49_v49, 0.0  ;;  %v158_v60 = vmax.f32 %v34_v54, 0.0  ;;  %v67_v61 = vld [vmem:[%s2055_s0 + $0x1b8] sm:$0xff]  ;;  %v18_v62 = vld [vmem:[%s2055_s0 + $0x30] sm:$0xff]  ;;  %v36_v6 = vld [vmem:[%s2055_s0 + $0xc0] sm:$0xff] }
   0xb   :  { %v19_v63 = vld [vmem:[%s2055_s0 + $0x38] sm:$0xff]  ;;  %v286_v0 = vpack.c.bf16 %v189_v51, %v188_v46  ;;  %v262_v1 = vpack.c.bf16 %v141_v53, %v140_v52  ;;  %v159_v2 = vmax.f32 %v35_v55, 0.0  ;;  %v190_v3 = vmax.f32 %v66_v56, 0.0  ;;  %v50_v4 = vld [vmem:[%s2055_s0 + $0x130] sm:$0xff]  ;;  %v37_v11 = vld [vmem:[%s2055_s0 + $0xc8] sm:$0xff] }
   0xc   :  { %959 = vmatpush3.bf16.msra.mxu0 %v261_v44  ;;  %v51_v5 = vld [vmem:[%s2055_s0 + $0x138] sm:$0xff]  ;;  %v278_v7 = vpack.c.bf16 %v173_v59, %v172_v58  ;;  %v191_v8 = vmax.f32 %v67_v61, 0.0  ;;  %v142_v9 = vmax.f32 %v18_v62, 0.0  ;;  %v143_v10 = vmax.f32 %v19_v63, 0.0  ;;  %v68_v12 = vld [vmem:[%s2055_s0 + $0x1c0] sm:$0xff]  ;;  %v69_v13 = vld [vmem:[%s2055_s0 + $0x1c8] sm:$0xff] }
   0xd   :  { %1023 = vmatpush3.bf16.msra.mxu1 %v277_v50  ;;  %960 = vmatprep.subr.bf16.mxu0 %v270_v57  ;;  %v271_v14 = vpack.c.bf16 %v159_v2, %v158_v60  ;;  %v174_v15 = vmax.f32 %v50_v4, 0.0  ;;  %v175_v16 = vmax.f32 %v51_v5, 0.0  ;;  %v160_v17 = vmax.f32 %v36_v6, 0.0  ;;  %v20_v18 = vld [vmem:[%s2055_s0 + $0x40] sm:$0xff]  ;;  %v21_v19 = vld [vmem:[%s2055_s0 + $0x48] sm:$0xff]  ;;  %v38_v26 = vld [vmem:[%s2055_s0 + $0xd0] sm:$0xff] }
   0xe   :  { %1024 = vmatprep.subr.bf16.mxu1 %v286_v0  ;;  %v52_v20 = vld [vmem:[%s2055_s0 + $0x140] sm:$0xff]  ;;  %v287_v21 = vpack.c.bf16 %v191_v8, %v190_v3  ;;  %v263_v22 = vpack.c.bf16 %v143_v10, %v142_v9  ;;  %v161_v23 = vmax.f32 %v37_v11, 0.0  ;;  %v192_v24 = vmax.f32 %v68_v12, 0.0  ;;  %v53_v25 = vld [vmem:[%s2055_s0 + $0x148] sm:$0xff]  ;;  %v39_v27 = vld [vmem:[%s2055_s0 + $0xd8] sm:$0xff] }
   0xf   :  { %v279_v28 = vpack.c.bf16 %v175_v16, %v174_v15  ;;  %v193_v29 = vmax.f32 %v69_v13, 0.0  ;;  %v144_v30 = vmax.f32 %v20_v18, 0.0  ;;  %v145_v31 = vmax.f32 %v21_v19, 0.0  ;;  %v70_v32 = vld [vmem:[%s2055_s0 + $0x1d0] sm:$0xff]  ;;  %v71_v33 = vld [vmem:[%s2055_s0 + $0x1d8] sm:$0xff]  ;;  %v40_v45 = vld [vmem:[%s2055_s0 + $0xe0] sm:$0xff] }
  0x10   :  { %961 = vmatpush3.bf16.msra.mxu0 %v262_v1  ;;  %v272_v34 = vpack.c.bf16 %v161_v23, %v160_v17  ;;  %v176_v35 = vmax.f32 %v52_v20, 0.0  ;;  %v177_v36 = vmax.f32 %v53_v25, 0.0  ;;  %v162_v37 = vmax.f32 %v38_v26, 0.0  ;;  %v22_v38 = vld [vmem:[%s2055_s0 + $0x50] sm:$0xff]  ;;  %v23_v39 = vld [vmem:[%s2055_s0 + $0x58] sm:$0xff]  ;;  %v41_v46 = vld [vmem:[%s2055_s0 + $0xe8] sm:$0xff] }
  0x11   :  { %1025 = vmatpush3.bf16.msra.mxu1 %v278_v7  ;;  %962 = vmatprep.subr.bf16.mxu0 %v271_v14  ;;  %v54_v40 = vld [vmem:[%s2055_s0 + $0x150] sm:$0xff]  ;;  %v288_v41 = vpack.c.bf16 %v193_v29, %v192_v24  ;;  %v163_v42 = vmax.f32 %v39_v27, 0.0  ;;  %v194_v43 = vmax.f32 %v70_v32, 0.0  ;;  %v55_v44 = vld [vmem:[%s2055_s0 + $0x158] sm:$0xff]  ;;  %v264_v47 = vpack.c.bf16 %v145_v31, %v144_v30  ;;  %v72_v49 = vld [vmem:[%s2055_s0 + $0x1e0] sm:$0xff] }
  0x12   :  { %1026 = vmatprep.subr.bf16.mxu1 %v287_v21  ;;  %v195_v48 = vmax.f32 %v71_v33, 0.0  ;;  %v73_v50 = vld [vmem:[%s2055_s0 + $0x1e8] sm:$0xff]  ;;  %v280_v51 = vpack.c.bf16 %v177_v36, %v176_v35  ;;  %v146_v52 = vmax.f32 %v22_v38, 0.0  ;;  %v147_v53 = vmax.f32 %v23_v39, 0.0  ;;  %v24_v55 = vld [vmem:[%s2055_s0 + $0x60] sm:$0xff]  ;;  %v42_v63 = vld [vmem:[%s2055_s0 + $0xf0] sm:$0xff] }
  0x13   :  { %v178_v54 = vmax.f32 %v54_v40, 0.0  ;;  %v25_v56 = vld [vmem:[%s2055_s0 + $0x68] sm:$0xff]  ;;  %v273_v57 = vpack.c.bf16 %v163_v42, %v162_v37  ;;  %v179_v58 = vmax.f32 %v55_v44, 0.0  ;;  %v164_v59 = vmax.f32 %v40_v45, 0.0  ;;  %v56_v61 = vld [vmem:[%s2055_s0 + $0x160] sm:$0xff]  ;;  %v43_v3 = vld [vmem:[%s2055_s0 + $0xf8] sm:$0xff] }
  0x14   :  { %963 = vmatpush3.bf16.msra.mxu0 %v263_v22  ;;  %v165_v60 = vmax.f32 %v41_v46, 0.0  ;;  %v57_v62 = vld [vmem:[%s2055_s0 + $0x168] sm:$0xff]  ;;  %v289_v0 = vpack.c.bf16 %v195_v48, %v194_v43  ;;  %v196_v1 = vmax.f32 %v72_v49, 0.0  ;;  %v197_v2 = vmax.f32 %v73_v50, 0.0  ;;  %v74_v4 = vld [vmem:[%s2055_s0 + $0x1f0] sm:$0xff]  ;;  %v75_v5 = vld [vmem:[%s2055_s0 + $0x1f8] sm:$0xff] }
  0x15   :  { %1027 = vmatpush3.bf16.msra.mxu1 %v279_v28  ;;  %964 = vmatprep.subr.bf16.mxu0 %v272_v34  ;;  %v148_v6 = vmax.f32 %v24_v55, 0.0  ;;  %v26_v7 = vld [vmem:[%s2055_s0 + $0x70] sm:$0xff]  ;;  %v323_v8 = vld [vmem:[%s2056_s1 + $0x8] sm:$0xff]  ;;  %v265_v10 = vpack.c.bf16 %v147_v53, %v146_v52  ;;  %v149_v11 = vmax.f32 %v25_v56, 0.0  ;;  %v180_v12 = vmax.f32 %v56_v61, 0.0  ;;  %v27_v14 = vld [vmem:[%s2055_s0 + $0x78] sm:$0xff] }
  0x16   :  { %1028 = vmatprep.subr.bf16.mxu1 %v288_v41  ;;  %v331_v9 = vld [vmem:[%s2056_s1 + $0x48] sm:$0xff]  ;;  %v181_v13 = vmax.f32 %v57_v62, 0.0  ;;  %v325_v15 = vld [vmem:[%s2056_s1 + $0x18] sm:$0xff]  ;;  %v281_v17 = vpack.c.bf16 %v179_v58, %v178_v54  ;;  %v274_v18 = vpack.c.bf16 %v165_v60, %v164_v59  ;;  %v166_v19 = vmax.f32 %v42_v63, 0.0  ;;  %v58_v21 = vld [vmem:[%s2055_s0 + $0x170] sm:$0xff] }
  0x17   :  { %v333_v16 = vld [vmem:[%s2056_s1 + $0x58] sm:$0xff]  ;;  %v167_v20 = vmax.f32 %v43_v3, 0.0  ;;  %v290_v22 = vpack.c.bf16 %v197_v2, %v196_v1  ;;  %v198_v23 = vmax.f32 %v74_v4, 0.0  ;;  %v199_v24 = vmax.f32 %v75_v5, 0.0  ;;  %v92_v27 = vld [vmem:[%s2055_s0 + $0x280] sm:$0xff]  ;;  %v93_v28 = vld [vmem:[%s2055_s0 + $0x288] sm:$0xff] }
  0x18   :  { %965 = vmatpush3.bf16.msra.mxu0 %v264_v47  ;;  %v59_v25 = vld [vmem:[%s2055_s0 + $0x178] sm:$0xff]  ;;  %v451_v26 = vpack.c.bf16 %v331_v9, %v323_v8  ;;  %v150_v29 = vmax.f32 %v26_v7, 0.0  ;;  %v151_v30 = vmax.f32 %v27_v14, 0.0  ;;  %v453_v31 = vpack.c.bf16 %v333_v16, %v325_v15  ;;  %v76_v35 = vld [vmem:[%s2055_s0 + $0x200] sm:$0xff]  ;;  %v77_v40 = vld [vmem:[%s2055_s0 + $0x208] sm:$0xff] }
  0x19   :  { %1029 = vmatpush3.bf16.msra.mxu1 %v280_v51  ;;  %966 = vmatprep.subr.bf16.mxu0 %v273_v57  ;;  %v266_v32 = vpack.c.bf16 %v149_v11, %v148_v6  ;;  %v282_v33 = vpack.c.bf16 %v181_v13, %v180_v12  ;;  %v182_v34 = vmax.f32 %v58_v21, 0.0  ;;  %v275_v36 = vpack.c.bf16 %v167_v20, %v166_v19  ;;  %v108_v41 = vld [vmem:[%s2055_s0 + $0x300] sm:$0xff]  ;;  %v109_v42 = vld [vmem:[%s2055_s0 + $0x308] sm:$0xff]  ;;  %v324_v46 = vld [vmem:[%s2056_s1 + $0x10] sm:$0xff] }
  0x1a   :  { %1030 = vmatprep.subr.bf16.mxu1 %v289_v0  ;;  %571 = vmatprep.mubr.bf16.mxu0 %v451_v26  ;;  %v183_v37 = vmax.f32 %v59_v25, 0.0  ;;  %v216_v38 = vmax.f32 %v92_v27, 0.0  ;;  %v217_v39 = vmax.f32 %v93_v28, 0.0  ;;  %v291_v43 = vpack.c.bf16 %v199_v24, %v198_v23  ;;  %v322_v44 = vld [vmem:[%s2056_s1] sm:$0xff]  ;;  %v332_v48 = vld [vmem:[%s2056_s1 + $0x50] sm:$0xff]  ;;  %v95_v50 = vld [vmem:[%s2055_s0 + $0x298] sm:$0xff] }
  0x1b   :  { %668 = vmatprep.mubr.bf16.mxu1 %v453_v31  ;;  %v330_v45 = vld [vmem:[%s2056_s1 + $0x40] sm:$0xff]  ;;  %v267_v47 = vpack.c.bf16 %v151_v30, %v150_v29  ;;  %v94_v49 = vld [vmem:[%s2055_s0 + $0x290] sm:$0xff]  ;;  %v200_v51 = vmax.f32 %v76_v35, 0.0  ;;  %v201_v52 = vmax.f32 %v77_v40, 0.0  ;;  %v232_v53 = vmax.f32 %v108_v41, 0.0  ;;  %v339_v55 = vld [vmem:[%s2056_s1 + $0x88] sm:$0xff] }
  0x1c   :  { %967 = vmatpush3.bf16.msra.mxu0 %v265_v10  ;;  %v233_v54 = vmax.f32 %v109_v42, 0.0  ;;  %v347_v56 = vld [vmem:[%s2056_s1 + $0xc8] sm:$0xff]  ;;  %v283_v57 = vpack.c.bf16 %v183_v37, %v182_v34  ;;  %v300_v58 = vpack.c.bf16 %v217_v39, %v216_v38  ;;  %v78_v59 = vld [vmem:[%s2055_s0 + $0x210] sm:$0xff]  ;;  %v79_v60 = vld [vmem:[%s2055_s0 + $0x218] sm:$0xff]  ;;  %v218_v61 = vmax.f32 %v94_v49, 0.0 }
  0x1d   :  { %1031 = vmatpush3.bf16.msra.mxu1 %v281_v17  ;;  %968 = vmatprep.subr.bf16.mxu0 %v274_v18  ;;  %v219_v62 = vmax.f32 %v95_v50, 0.0  ;;  %v110_v63 = vld [vmem:[%s2055_s0 + $0x310] sm:$0xff]  ;;  %v111_v0 = vld [vmem:[%s2055_s0 + $0x318] sm:$0xff]  ;;  %v450_v1 = vpack.c.bf16 %v330_v45, %v322_v44  ;;  %v452_v2 = vpack.c.bf16 %v332_v48, %v324_v46  ;;  %v459_v3 = vpack.c.bf16 %v347_v56, %v339_v55  ;;  %v96_v6 = vld [vmem:[%s2055_s0 + $0x2a0] sm:$0xff] }
  0x1e   :  { %1032 = vmatprep.subr.bf16.mxu1 %v290_v22  ;;  %v341_v4 = vld [vmem:[%s2056_s1 + $0x98] sm:$0xff]  ;;  %v292_v7 = vpack.c.bf16 %v201_v52, %v200_v51  ;;  %v308_v8 = vpack.c.bf16 %v233_v54, %v232_v53  ;;  %v202_v9 = vmax.f32 %v78_v59, 0.0  ;;  %v203_v10 = vmax.f32 %v79_v60, 0.0  ;;  %v97_v11 = vld [vmem:[%s2055_s0 + $0x2a8] sm:$0xff]  ;;  %v338_v18 = vld [vmem:[%s2056_s1 + $0x80] sm:$0xff] }
  0x1f   :  { %v349_v5 = vld [vmem:[%s2056_s1 + $0xd8] sm:$0xff]  ;;  %v234_v12 = vmax.f32 %v110_v63, 0.0  ;;  %v235_v13 = vmax.f32 %v111_v0, 0.0  ;;  %v220_v14 = vmax.f32 %v96_v6, 0.0  ;;  %v221_v15 = vmax.f32 %v97_v11, 0.0  ;;  %v346_v19 = vld [vmem:[%s2056_s1 + $0xc0] sm:$0xff] }
  0x20   :  { %969 = vmatpush3.bf16.msra.mxu0 %v266_v32  ;;  %v1149_v16 = vmov 0   ;;  %v461_v17 = vpack.c.bf16 %v349_v5, %v341_v4  ;;  %v301_v20 = vpack.c.bf16 %v219_v62, %v218_v61  ;;  %v112_v21 = vld [vmem:[%s2055_s0 + $0x320] sm:$0xff]  ;;  %v113_v22 = vld [vmem:[%s2055_s0 + $0x328] sm:$0xff]  ;;  %v340_v23 = vld [vmem:[%s2056_s1 + $0x90] sm:$0xff]  ;;  %v293_v27 = vpack.c.bf16 %v203_v10, %v202_v9 }
  0x21   :  { %1033 = vmatpush3.bf16.msra.mxu1 %v282_v33  ;;  %970 = vmatprep.subr.bf16.mxu0 %v275_v36  ;;  %v80_v24 = vld [vmem:[%s2055_s0 + $0x220] sm:$0xff]  ;;  %v81_v25 = vld [vmem:[%s2055_s0 + $0x228] sm:$0xff]  ;;  %v348_v26 = vld [vmem:[%s2056_s1 + $0xd0] sm:$0xff]  ;;  %v309_v30 = vpack.c.bf16 %v235_v13, %v234_v12  ;;  %v302_v32 = vpack.c.bf16 %v221_v15, %v220_v14  ;;  %v236_v33 = vmax.f32 %v112_v21, 0.0  ;;  %v237_v34 = vmax.f32 %v113_v22, 0.0 }
  0x22   :  { %1034 = vmatprep.subr.bf16.mxu1 %v291_v43  ;;  %v355_v28 = vld [vmem:[%s2056_s1 + $0x108] sm:$0xff]  ;;  %v357_v31 = vld [vmem:[%s2056_s1 + $0x118] sm:$0xff]  ;;  %v98_v35 = vld [vmem:[%s2055_s0 + $0x2b0] sm:$0xff]  ;;  %v204_v38 = vmax.f32 %v80_v24, 0.0  ;;  %v205_v39 = vmax.f32 %v81_v25, 0.0  ;;  %v458_v42 = vpack.c.bf16 %v346_v19, %v338_v18 }
  0x23   :  { %v363_v29 = vld [vmem:[%s2056_s1 + $0x148] sm:$0xff]  ;;  %v99_v36 = vld [vmem:[%s2055_s0 + $0x2b8] sm:$0xff]  ;;  %v114_v40 = vld [vmem:[%s2055_s0 + $0x330] sm:$0xff]  ;;  %v222_v43 = vmax.f32 %v98_v35, 0.0  ;;  %v310_v50 = vpack.c.bf16 %v237_v34, %v236_v33 }
  0x24   :  { %971 = vmatpush3.bf16.msra.mxu0 %v267_v47  ;;  %v365_v37 = vld [vmem:[%s2056_s1 + $0x158] sm:$0xff]  ;;  %v223_v44 = vmax.f32 %v99_v36, 0.0  ;;  %v82_v45 = vld [vmem:[%s2055_s0 + $0x230] sm:$0xff]  ;;  %v460_v47 = vpack.c.bf16 %v348_v26, %v340_v23  ;;  %v467_v48 = vpack.c.bf16 %v363_v29, %v355_v28  ;;  %v238_v51 = vmax.f32 %v114_v40, 0.0  ;;  %v116_v53 = vld [vmem:[%s2055_s0 + $0x340] sm:$0xff] }
  0x25   :  { %1035 = vmatpush3.bf16.msra.mxu1 %v283_v57  ;;  %1084 = vmatprep.subr.bf16.mxu0 %v300_v58  ;;  %v115_v41 = vld [vmem:[%s2055_s0 + $0x338] sm:$0xff]  ;;  %v469_v49 = vpack.c.bf16 %v365_v37, %v357_v31  ;;  %v354_v54 = vld [vmem:[%s2056_s1 + $0x100] sm:$0xff]  ;;  %v294_v55 = vpack.c.bf16 %v205_v39, %v204_v38  ;;  %v206_v56 = vmax.f32 %v82_v45, 0.0  ;;  %v117_v58 = vld [vmem:[%s2055_s0 + $0x348] sm:$0xff] }
  0x26   :  { %830 = vmatprep.subr.bf16.mxu1 %v1149_v16  ;;  %v83_v46 = vld [vmem:[%s2055_s0 + $0x238] sm:$0xff]  ;;  %v239_v52 = vmax.f32 %v115_v41, 0.0  ;;  %v100_v59 = vld [vmem:[%s2055_s0 + $0x2c0] sm:$0xff]  ;;  %v101_v60 = vld [vmem:[%s2055_s0 + $0x2c8] sm:$0xff]  ;;  %v303_v62 = vpack.c.bf16 %v223_v44, %v222_v43  ;;  %v241_v9 = vmax.f32 %v117_v58, 0.0 }
  0x27   :  { %572 = vmatmul.mubr.bf16.vlgmr.msra.gmra.mrb[0].mxu0 %v450_v1  ;;  %v207_v57 = vmax.f32 %v83_v46, 0.0  ;;  %v362_v61 = vld [vmem:[%s2056_s1 + $0x140] sm:$0xff]  ;;  %v224_v63 = vmax.f32 %v100_v59, 0.0  ;;  %v225_v0 = vmax.f32 %v101_v60, 0.0  ;;  %v364_v4 = vld [vmem:[%s2056_s1 + $0x150] sm:$0xff]  ;;  %v371_v5 = vld [vmem:[%s2056_s1 + $0x188] sm:$0xff] }
  0x28   :  { %669 = vmatmul.mubr.bf16.vlgmr.msra.gmra.mrb[0].mxu1 %v452_v2  ;;  %1085 = vmatpush3.bf16.msra.mxu0 %v292_v7  ;;  %v84_v1 = vld [vmem:[%s2055_s0 + $0x240] sm:$0xff]  ;;  %v85_v2 = vld [vmem:[%s2055_s0 + $0x248] sm:$0xff]  ;;  %v311_v6 = vpack.c.bf16 %v239_v52, %v238_v51  ;;  %v118_v10 = vld [vmem:[%s2055_s0 + $0x350] sm:$0xff]  ;;  %v466_v18 = vpack.c.bf16 %v362_v61, %v354_v54 }
  0x29   :  { %831 = vmatpush1.bf16.msra.mxu1 %v308_v8  ;;  %579 = vmatprep.mubr.bf16.mxu0 %v459_v3  ;;  %v356_v3 = vld [vmem:[%s2056_s1 + $0x110] sm:$0xff]  ;;  %v379_v7 = vld [vmem:[%s2056_s1 + $0x1c8] sm:$0xff]  ;;  %v240_v8 = vmax.f32 %v116_v53, 0.0  ;;  %v119_v11 = vld [vmem:[%s2055_s0 + $0x358] sm:$0xff]  ;;  %v295_v14 = vpack.c.bf16 %v207_v57, %v206_v56  ;;  %v208_v15 = vmax.f32 %v84_v1, 0.0  ;;  %v242_v23 = vmax.f32 %v118_v10, 0.0 }
  0x2a   :  { %676 = vmatprep.mubr.bf16.mxu1 %v461_v17  ;;  %1086 = vmatprep.subr.bf16.mxu0 %v301_v20  ;;  %v373_v12 = vld [vmem:[%s2056_s1 + $0x198] sm:$0xff]  ;;  %v209_v17 = vmax.f32 %v85_v2, 0.0  ;;  %v468_v19 = vpack.c.bf16 %v364_v4, %v356_v3  ;;  %v304_v20 = vpack.c.bf16 %v225_v0, %v224_v63  ;;  %v102_v21 = vld [vmem:[%s2055_s0 + $0x2d0] sm:$0xff]  ;;  %v475_v22 = vpack.c.bf16 %v379_v7, %v371_v5  ;;  %v378_v33 = vld [vmem:[%s2056_s1 + $0x1c0] sm:$0xff] }
  0x2b   :  { %832 = vmatprep.subr.bf16.mxu1 %v1149_v16  ;;  %v381_v13 = vld [vmem:[%s2056_s1 + $0x1d8] sm:$0xff]  ;;  %v243_v24 = vmax.f32 %v119_v11, 0.0  ;;  %v226_v26 = vmax.f32 %v102_v21, 0.0  ;;  %v120_v35 = vld [vmem:[%s2055_s0 + $0x360] sm:$0xff]  ;;  %v121_v36 = vld [vmem:[%s2055_s0 + $0x368] sm:$0xff] }
  0x2c   :  { %1087 = vmatpush3.bf16.msra.mxu0 %v293_v27  ;;  %v103_v25 = vld [vmem:[%s2055_s0 + $0x2d8] sm:$0xff]  ;;  %v86_v27 = vld [vmem:[%s2055_s0 + $0x250] sm:$0xff]  ;;  %v477_v29 = vpack.c.bf16 %v381_v13, %v373_v12  ;;  %v296_v34 = vpack.c.bf16 %v209_v17, %v208_v15  ;;  %v387_v41 = vld [vmem:[%s2056_s1 + $0x208] sm:$0xff] }
  0x2d   :  { %833 = vmatpush1.bf16.msra.mxu1 %v309_v30  ;;  %1088 = vmatprep.subr.bf16.mxu0 %v302_v32  ;;  %v87_v28 = vld [vmem:[%s2055_s0 + $0x258] sm:$0xff]  ;;  %v312_v30 = vpack.c.bf16 %v241_v9, %v240_v8  ;;  %v227_v31 = vmax.f32 %v103_v25, 0.0  ;;  %v370_v32 = vld [vmem:[%s2056_s1 + $0x180] sm:$0xff]  ;;  %v210_v37 = vmax.f32 %v86_v27, 0.0  ;;  %v372_v39 = vld [vmem:[%s2056_s1 + $0x190] sm:$0xff]  ;;  %v313_v44 = vpack.c.bf16 %v243_v24, %v242_v23 }
  0x2e   :  { %834 = vmatprep.subr.bf16.mxu1 %v1149_v16  ;;  %v211_v38 = vmax.f32 %v87_v28, 0.0  ;;  %v380_v40 = vld [vmem:[%s2056_s1 + $0x1d0] sm:$0xff]  ;;  %v389_v45 = vld [vmem:[%s2056_s1 + $0x218] sm:$0xff]  ;;  %v104_v46 = vld [vmem:[%s2055_s0 + $0x2e0] sm:$0xff]  ;;  %v474_v59 = vpack.c.bf16 %v378_v33, %v370_v32 }
  0x2f   :  { %580 = vmatmul.mubr.bf16.gmra.mrb[4].mxu0 %v458_v42  ;;  %v395_v42 = vld [vmem:[%s2056_s1 + $0x248] sm:$0xff]  ;;  %v305_v43 = vpack.c.bf16 %v227_v31, %v226_v26  ;;  %v228_v51 = vmax.f32 %v104_v46, 0.0  ;;  %v88_v53 = vld [vmem:[%s2055_s0 + $0x260] sm:$0xff]  ;;  %v122_v54 = vld [vmem:[%s2055_s0 + $0x370] sm:$0xff] }
  0x30   :  { %677 = vmatmul.mubr.bf16.gmra.mrb[4].mxu1 %v460_v47  ;;  %587 = vmatprep.mubr.bf16.mxu0 %v467_v48  ;;  %v105_v47 = vld [vmem:[%s2055_s0 + $0x2e8] sm:$0xff]  ;;  %v397_v48 = vld [vmem:[%s2056_s1 + $0x258] sm:$0xff]  ;;  %v297_v56 = vpack.c.bf16 %v211_v38, %v210_v37  ;;  %v212_v58 = vmax.f32 %v88_v53, 0.0  ;;  %v483_v63 = vpack.c.bf16 %v395_v42, %v387_v41  ;;  %v246_v2 = vmax.f32 %v122_v54, 0.0  ;;  %v106_v4 = vld [vmem:[%s2055_s0 + $0x2f0] sm:$0xff] }
  0x31   :  { %684 = vmatprep.mubr.bf16.mxu1 %v469_v49  ;;  %835 = vmatpush1.bf16.msra.mxu1 %v310_v50  ;;  %v244_v49 = vmax.f32 %v120_v35, 0.0  ;;  %v245_v50 = vmax.f32 %v121_v36, 0.0  ;;  %v229_v52 = vmax.f32 %v105_v47, 0.0  ;;  %v89_v57 = vld [vmem:[%s2055_s0 + $0x268] sm:$0xff]  ;;  %v485_v0 = vpack.c.bf16 %v397_v48, %v389_v45  ;;  %v124_v5 = vld [vmem:[%s2055_s0 + $0x380] sm:$0xff]  ;;  %v107_v8 = vld [vmem:[%s2055_s0 + $0x2f8] sm:$0xff] }
  0x32   :  { %1089 = vmatpush3.bf16.msra.mxu0 %v294_v55  ;;  %836 = vmatprep.subr.bf16.mxu1 %v1149_v16  ;;  %v123_v55 = vld [vmem:[%s2055_s0 + $0x378] sm:$0xff]  ;;  %v213_v61 = vmax.f32 %v89_v57, 0.0  ;;  %v230_v9 = vmax.f32 %v106_v4, 0.0  ;;  %v386_v10 = vld [vmem:[%s2056_s1 + $0x200] sm:$0xff]  ;;  %v231_v11 = vmax.f32 %v107_v8, 0.0  ;;  %v90_v12 = vld [vmem:[%s2055_s0 + $0x270] sm:$0xff] }
  0x33   :  { %1090 = vmatprep.subr.bf16.mxu0 %v303_v62  ;;  %v306_v60 = vpack.c.bf16 %v229_v52, %v228_v51  ;;  %v476_v62 = vpack.c.bf16 %v380_v40, %v372_v39  ;;  %v314_v1 = vpack.c.bf16 %v245_v50, %v244_v49  ;;  %v247_v3 = vmax.f32 %v123_v55, 0.0  ;;  %v91_v13 = vld [vmem:[%s2055_s0 + $0x278] sm:$0xff]  ;;  %v388_v15 = vld [vmem:[%s2056_s1 + $0x210] sm:$0xff]  ;;  %v403_v21 = vld [vmem:[%s2056_s1 + $0x288] sm:$0xff] }
  0x34   :  { %v298_v7 = vpack.c.bf16 %v213_v61, %v212_v58  ;;  %v396_v17 = vld [vmem:[%s2056_s1 + $0x250] sm:$0xff]  ;;  %v405_v23 = vld [vmem:[%s2056_s1 + $0x298] sm:$0xff]  ;;  %v248_v24 = vmax.f32 %v124_v5, 0.0  ;;  %v307_v26 = vpack.c.bf16 %v231_v11, %v230_v9  ;;  %v128_v38 = vld [vmem:[%s2055_s0 + $0x3a0] sm:$0xff] }
  0x35   :  { %837 = vmatpush1.bf16.msra.mxu1 %v311_v6  ;;  %v125_v6 = vld [vmem:[%s2055_s0 + $0x388] sm:$0xff]  ;;  %v413_v27 = vld [vmem:[%s2056_s1 + $0x2d8] sm:$0xff]  ;;  %v126_v28 = vld [vmem:[%s2055_s0 + $0x390] sm:$0xff]  ;;  %v484_v32 = vpack.c.bf16 %v396_v17, %v388_v15  ;;  %v252_v48 = vmax.f32 %v128_v38, 0.0 }
  0x36   :  { %838 = vmatprep.subr.bf16.mxu1 %v1149_v16  ;;  %1091 = vmatpush3.bf16.msra.mxu0 %v295_v14  ;;  %v394_v14 = vld [vmem:[%s2056_s1 + $0x240] sm:$0xff]  ;;  %v249_v25 = vmax.f32 %v125_v6, 0.0  ;;  %v250_v36 = vmax.f32 %v126_v28, 0.0  ;;  %v129_v39 = vld [vmem:[%s2055_s0 + $0x3a8] sm:$0xff]  ;;  %v404_v42 = vld [vmem:[%s2056_s1 + $0x290] sm:$0xff] }
  0x37   :  { %588 = vmatmul.mubr.bf16.gmra.mrb[8].mxu0 %v466_v18  ;;  %1092 = vmatprep.subr.bf16.mxu0 %v304_v20  ;;  %v214_v18 = vmax.f32 %v90_v12, 0.0  ;;  %v315_v20 = vpack.c.bf16 %v247_v3, %v246_v2  ;;  %v482_v31 = vpack.c.bf16 %v394_v14, %v386_v10  ;;  %v402_v40 = vld [vmem:[%s2056_s1 + $0x280] sm:$0xff]  ;;  %v427_v45 = vld [vmem:[%s2056_s1 + $0x348] sm:$0xff]  ;;  %v421_v46 = vld [vmem:[%s2056_s1 + $0x318] sm:$0xff]  ;;  %v253_v49 = vmax.f32 %v129_v39, 0.0 }
  0x38   :  { %685 = vmatmul.mubr.bf16.gmra.mrb[8].mxu1 %v468_v19  ;;  %595 = vmatprep.mubr.bf16.mxu0 %v475_v22  ;;  %v215_v19 = vmax.f32 %v91_v13, 0.0  ;;  %v411_v22 = vld [vmem:[%s2056_s1 + $0x2c8] sm:$0xff]  ;;  %v316_v35 = vpack.c.bf16 %v249_v25, %v248_v24  ;;  %v410_v41 = vld [vmem:[%s2056_s1 + $0x2c0] sm:$0xff]  ;;  %v429_v50 = vld [vmem:[%s2056_s1 + $0x358] sm:$0xff] }
  0x39   :  { %692 = vmatprep.mubr.bf16.mxu1 %v477_v29  ;;  %839 = vmatpush1.bf16.msra.mxu1 %v312_v30  ;;  %v127_v29 = vld [vmem:[%s2055_s0 + $0x398] sm:$0xff]  ;;  %v491_v33 = vpack.c.bf16 %v411_v22, %v403_v21  ;;  %v130_v51 = vld [vmem:[%s2055_s0 + $0x3b0] sm:$0xff]  ;;  %v490_v53 = vpack.c.bf16 %v410_v41, %v402_v40  ;;  %v318_v57 = vpack.c.bf16 %v253_v49, %v252_v48  ;;  %v133_v61 = vld [vmem:[%s2055_s0 + $0x3c8] sm:$0xff] }
  0x3a   :  { %840 = vmatprep.subr.bf16.mxu1 %v1149_v16  ;;  %1093 = vmatpush3.bf16.msra.mxu0 %v296_v34  ;;  %v299_v30 = vpack.c.bf16 %v215_v19, %v214_v18  ;;  %v493_v34 = vpack.c.bf16 %v413_v27, %v405_v23  ;;  %v251_v37 = vmax.f32 %v127_v29, 0.0  ;;  %v131_v52 = vld [vmem:[%s2055_s0 + $0x3b8] sm:$0xff]  ;;  %v254_v58 = vmax.f32 %v130_v51, 0.0  ;;  %v435_v2 = vld [vmem:[%s2056_s1 + $0x388] sm:$0xff]  ;;  %v134_v9 = vld [vmem:[%s2055_s0 + $0x3d0] sm:$0xff] }
  0x3b   :  { %1094 = vmatprep.subr.bf16.mxu0 %v305_v43  ;;  %v412_v43 = vld [vmem:[%s2056_s1 + $0x2d0] sm:$0xff]  ;;  %v443_v3 = vld [vmem:[%s2056_s1 + $0x3c8] sm:$0xff]  ;;  %v437_v4 = vld [vmem:[%s2056_s1 + $0x398] sm:$0xff]  ;;  %v258_v17 = vmax.f32 %v134_v9, 0.0 }
  0x3c   :  { %v317_v47 = vpack.c.bf16 %v251_v37, %v250_v36  ;;  %v492_v54 = vpack.c.bf16 %v412_v43, %v404_v42  ;;  %v445_v8 = vld [vmem:[%s2056_s1 + $0x3d8] sm:$0xff]  ;;  %v507_v13 = vpack.c.bf16 %v443_v3, %v435_v2  ;;  %v434_v19 = vld [vmem:[%s2056_s1 + $0x380] sm:$0xff]  ;;  %v436_v21 = vld [vmem:[%s2056_s1 + $0x390] sm:$0xff] }
  0x3d   :  { %841 = vmatpush1.bf16.msra.mxu1 %v313_v44  ;;  %v419_v44 = vld [vmem:[%s2056_s1 + $0x308] sm:$0xff]  ;;  %v135_v10 = vld [vmem:[%s2055_s0 + $0x3d8] sm:$0xff]  ;;  %v509_v14 = vpack.c.bf16 %v445_v8, %v437_v4  ;;  %v444_v22 = vld [vmem:[%s2056_s1 + $0x3d0] sm:$0xff] }
  0x3e   :  { %842 = vmatprep.subr.bf16.mxu1 %v1149_v16  ;;  %1095 = vmatpush3.bf16.msra.mxu0 %v297_v56  ;;  %v499_v55 = vpack.c.bf16 %v427_v45, %v419_v44  ;;  %v501_v56 = vpack.c.bf16 %v429_v50, %v421_v46  ;;  %v259_v18 = vmax.f32 %v135_v10, 0.0  ;;  %v327_v23 = vld [vmem:[%s2056_s1 + $0x28] sm:$0xff]  ;;  %v337_v27 = vld [vmem:[%s2056_s1 + $0x78] sm:$0xff]  ;;  %v508_v29 = vpack.c.bf16 %v444_v22, %v436_v21  ;;  %v342_v43 = vld [vmem:[%s2056_s1 + $0xa0] sm:$0xff] }
  0x3f   :  { %596 = vmatmul.mubr.bf16.gmra.mrb[12].mxu0 %v474_v59  ;;  %1096 = vmatprep.subr.bf16.mxu0 %v306_v60  ;;  %v255_v59 = vmax.f32 %v131_v52, 0.0  ;;  %v132_v60 = vld [vmem:[%s2055_s0 + $0x3c0] sm:$0xff]  ;;  %v335_v24 = vld [vmem:[%s2056_s1 + $0x68] sm:$0xff]  ;;  %v345_v37 = vld [vmem:[%s2056_s1 + $0xb8] sm:$0xff] }
  0x40   :  { %693 = vmatmul.mubr.bf16.gmra.mrb[12].mxu1 %v476_v62  ;;  %603 = vmatprep.mubr.bf16.mxu0 %v483_v63  ;;  %v418_v62 = vld [vmem:[%s2056_s1 + $0x300] sm:$0xff]  ;;  %v256_v6 = vmax.f32 %v132_v60, 0.0  ;;  %v321_v25 = vpack.c.bf16 %v259_v18, %v258_v17  ;;  %v351_v36 = vld [vmem:[%s2056_s1 + $0xe8] sm:$0xff]  ;;  %v353_v38 = vld [vmem:[%s2056_s1 + $0xf8] sm:$0xff] }
  0x41   :  { %700 = vmatprep.mubr.bf16.mxu1 %v485_v0  ;;  %843 = vmatpush1.bf16.msra.mxu1 %v314_v1  ;;  %v426_v63 = vld [vmem:[%s2056_s1 + $0x340] sm:$0xff]  ;;  %v420_v0 = vld [vmem:[%s2056_s1 + $0x310] sm:$0xff]  ;;  %v319_v5 = vpack.c.bf16 %v255_v59, %v254_v58  ;;  %v465_v42 = vpack.c.bf16 %v353_v38, %v345_v37  ;;  %v367_v48 = vld [vmem:[%s2056_s1 + $0x168] sm:$0xff] }
  0x42   :  { %844 = vmatprep.subr.bf16.mxu1 %v1149_v16  ;;  %1097 = vmatpush3.bf16.msra.mxu0 %v298_v7  ;;  %v428_v1 = vld [vmem:[%s2056_s1 + $0x350] sm:$0xff]  ;;  %v257_v7 = vmax.f32 %v133_v61, 0.0  ;;  %v498_v11 = vpack.c.bf16 %v426_v63, %v418_v62  ;;  %v350_v44 = vld [vmem:[%s2056_s1 + $0xe0] sm:$0xff]  ;;  %v361_v49 = vld [vmem:[%s2056_s1 + $0x138] sm:$0xff] }
  0x43   :  { %1098 = vmatprep.subr.bf16.mxu0 %v307_v26  ;;  %v500_v12 = vpack.c.bf16 %v428_v1, %v420_v0  ;;  %v329_v26 = vld [vmem:[%s2056_s1 + $0x38] sm:$0xff]  ;;  %v344_v45 = vld [vmem:[%s2056_s1 + $0xb0] sm:$0xff]  ;;  %v462_v51 = vpack.c.bf16 %v350_v44, %v342_v43  ;;  %v375_v59 = vld [vmem:[%s2056_s1 + $0x1a8] sm:$0xff] }
  0x44   :  { %v320_v15 = vpack.c.bf16 %v257_v7, %v256_v6  ;;  %v352_v46 = vld [vmem:[%s2056_s1 + $0xf0] sm:$0xff]  ;;  %v369_v50 = vld [vmem:[%s2056_s1 + $0x178] sm:$0xff]  ;;  %v383_v60 = vld [vmem:[%s2056_s1 + $0x1e8] sm:$0xff] }
  0x45   :  { %845 = vmatpush1.bf16.msra.mxu1 %v315_v20  ;;  %v442_v20 = vld [vmem:[%s2056_s1 + $0x3c0] sm:$0xff]  ;;  %v464_v52 = vpack.c.bf16 %v352_v46, %v344_v45  ;;  %v368_v58 = vld [vmem:[%s2056_s1 + $0x170] sm:$0xff]  ;;  %v377_v61 = vld [vmem:[%s2056_s1 + $0x1b8] sm:$0xff]  ;;  %v479_v1 = vpack.c.bf16 %v383_v60, %v375_v59 }
  0x46   :  { %846 = vmatprep.subr.bf16.mxu1 %v1149_v16  ;;  %1099 = vmatpush3.bf16.msra.mxu0 %v299_v30  ;;  %v506_v28 = vpack.c.bf16 %v442_v20, %v434_v19  ;;  %v455_v30 = vpack.c.bf16 %v335_v24, %v327_v23  ;;  %v385_v62 = vld [vmem:[%s2056_s1 + $0x1f8] sm:$0xff]  ;;  %v374_v3 = vld [vmem:[%s2056_s1 + $0x1a0] sm:$0xff]  ;;  %v384_v6 = vld [vmem:[%s2056_s1 + $0x1f0] sm:$0xff] }
  0x47   :  { %604 = vmatmul.mubr.bf16.gmra.mrb[16].mxu0 %v482_v31  ;;  %v457_v31 = vpack.c.bf16 %v337_v27, %v329_v26  ;;  %v481_v2 = vpack.c.bf16 %v385_v62, %v377_v61  ;;  %v382_v4 = vld [vmem:[%s2056_s1 + $0x1e0] sm:$0xff]  ;;  %v391_v7 = vld [vmem:[%s2056_s1 + $0x228] sm:$0xff]  ;;  %v393_v9 = vld [vmem:[%s2056_s1 + $0x238] sm:$0xff] }
  0x48   :  { %701 = vmatmul.mubr.bf16.gmra.mrb[16].mxu1 %v484_v32  ;;  %611 = vmatprep.mubr.bf16.mxu0 %v491_v33  ;;  %v334_v32 = vld [vmem:[%s2056_s1 + $0x60] sm:$0xff]  ;;  %v328_v33 = vld [vmem:[%s2056_s1 + $0x30] sm:$0xff]  ;;  %v399_v8 = vld [vmem:[%s2056_s1 + $0x268] sm:$0xff] }
  0x49   :  { %708 = vmatprep.mubr.bf16.mxu1 %v493_v34  ;;  %847 = vmatpush1.bf16.msra.mxu1 %v316_v35  ;;  %v336_v34 = vld [vmem:[%s2056_s1 + $0x70] sm:$0xff]  ;;  %v343_v35 = vld [vmem:[%s2056_s1 + $0xa8] sm:$0xff]  ;;  %v401_v10 = vld [vmem:[%s2056_s1 + $0x278] sm:$0xff] }
  0x4a   :  { %848 = vmatprep.subr.bf16.mxu1 %v1149_v16  ;;  %v456_v40 = vpack.c.bf16 %v336_v34, %v328_v33  ;;  %v463_v41 = vpack.c.bf16 %v351_v36, %v343_v35  ;;  %v398_v17 = vld [vmem:[%s2056_s1 + $0x260] sm:$0xff]  ;;  %v392_v18 = vld [vmem:[%s2056_s1 + $0x230] sm:$0xff]  ;;  %v407_v20 = vld [vmem:[%s2056_s1 + $0x2a8] sm:$0xff] }
  0x4b   :  { %v400_v19 = vld [vmem:[%s2056_s1 + $0x270] sm:$0xff]  ;;  %v415_v21 = vld [vmem:[%s2056_s1 + $0x2e8] sm:$0xff]  ;;  %v409_v22 = vld [vmem:[%s2056_s1 + $0x2b8] sm:$0xff] }
  0x4c   :  { %v417_v23 = vld [vmem:[%s2056_s1 + $0x2f8] sm:$0xff]  ;;  %v495_v26 = vpack.c.bf16 %v415_v21, %v407_v20  ;;  %v439_v43 = vld [vmem:[%s2056_s1 + $0x3a8] sm:$0xff] }
  0x4d   :  { %849 = vmatpush1.bf16.msra.mxu1 %v317_v47  ;;  %v359_v47 = vld [vmem:[%s2056_s1 + $0x128] sm:$0xff]  ;;  %v497_v27 = vpack.c.bf16 %v417_v23, %v409_v22  ;;  %v425_v33 = vld [vmem:[%s2056_s1 + $0x338] sm:$0xff] }
  0x4e   :  { %850 = vmatprep.subr.bf16.mxu1 %v1149_v16  ;;  %v433_v34 = vld [vmem:[%s2056_s1 + $0x378] sm:$0xff]  ;;  %v447_v44 = vld [vmem:[%s2056_s1 + $0x3e8] sm:$0xff] }
  0x4f   :  { %612 = vmatmul.mubr.bf16.gmra.mrb[20].mxu0 %v490_v53  ;;  %v471_v53 = vpack.c.bf16 %v367_v48, %v359_v47  ;;  %v505_v38 = vpack.c.bf16 %v433_v34, %v425_v33  ;;  %v441_v45 = vld [vmem:[%s2056_s1 + $0x3b8] sm:$0xff] }
  0x50   :  { %709 = vmatmul.mubr.bf16.gmra.mrb[20].mxu1 %v492_v54  ;;  %619 = vmatprep.mubr.bf16.mxu0 %v499_v55  ;;  %v473_v54 = vpack.c.bf16 %v369_v50, %v361_v49  ;;  %v358_v55 = vld [vmem:[%s2056_s1 + $0x120] sm:$0xff]  ;;  %v449_v46 = vld [vmem:[%s2056_s1 + $0x3f8] sm:$0xff]  ;;  %v511_v49 = vpack.c.bf16 %v447_v44, %v439_v43 }
  0x51   :  { %716 = vmatprep.mubr.bf16.mxu1 %v501_v56  ;;  %851 = vmatpush1.bf16.msra.mxu1 %v318_v57  ;;  %v366_v56 = vld [vmem:[%s2056_s1 + $0x160] sm:$0xff]  ;;  %v360_v57 = vld [vmem:[%s2056_s1 + $0x130] sm:$0xff]  ;;  %v513_v50 = vpack.c.bf16 %v449_v46, %v441_v45 }
  0x52   :  { %852 = vmatprep.subr.bf16.mxu1 %v1149_v16  ;;  %v470_v63 = vpack.c.bf16 %v366_v56, %v358_v55  ;;  %v472_v0 = vpack.c.bf16 %v368_v58, %v360_v57 }
  0x55   :  { %853 = vmatpush1.bf16.msra.mxu1 %v319_v5  ;;  %v376_v5 = vld [vmem:[%s2056_s1 + $0x1b0] sm:$0xff] }
  0x56   :  { %854 = vmatprep.subr.bf16.mxu1 %v1149_v16 }
  0x57   :  { %620 = vmatmul.mubr.bf16.gmra.mrb[24].mxu0 %v498_v11  ;;  %v478_v11 = vpack.c.bf16 %v382_v4, %v374_v3 }
  0x58   :  { %717 = vmatmul.mubr.bf16.gmra.mrb[24].mxu1 %v500_v12  ;;  %627 = vmatprep.mubr.bf16.mxu0 %v507_v13  ;;  %v480_v12 = vpack.c.bf16 %v384_v6, %v376_v5  ;;  %v487_v13 = vpack.c.bf16 %v399_v8, %v391_v7 }
  0x59   :  { %724 = vmatprep.mubr.bf16.mxu1 %v509_v14  ;;  %855 = vmatpush1.bf16.msra.mxu1 %v320_v15  ;;  %v489_v14 = vpack.c.bf16 %v401_v10, %v393_v9  ;;  %v390_v15 = vld [vmem:[%s2056_s1 + $0x220] sm:$0xff] }
  0x5a   :  { %856 = vmatprep.subr.bf16.mxu1 %v1149_v16  ;;  %v326_v16 = vld [vmem:[%s2056_s1 + $0x20] sm:$0xff]  ;;  %v486_v24 = vpack.c.bf16 %v398_v17, %v390_v15 }
  0x5b   :  { %v454_v39 = vpack.c.bf16 %v334_v32, %v326_v16  ;;  %v423_v16 = vld [vmem:[%s2056_s1 + $0x328] sm:$0xff] }
  0x5c   :  { %v431_v32 = vld [vmem:[%s2056_s1 + $0x368] sm:$0xff] }
  0x5d   :  { %857 = vmatpush1.bf16.msra.mxu1 %v321_v25  ;;  %v488_v25 = vpack.c.bf16 %v400_v19, %v392_v18  ;;  %v503_v37 = vpack.c.bf16 %v431_v32, %v423_v16 }
  0x5f   :  { %628 = vmatmul.mubr.bf16.gmra.mrb[28].mxu0 %v506_v28  ;;  %v406_v28 = vld [vmem:[%s2056_s1 + $0x2a0] sm:$0xff] }
  0x60   :  { %725 = vmatmul.mubr.bf16.gmra.mrb[28].mxu1 %v508_v29  ;;  %765 = vmatprep.mubr.bf16.mxu0 %v455_v30  ;;  %v414_v29 = vld [vmem:[%s2056_s1 + $0x2e0] sm:$0xff]  ;;  %v408_v30 = vld [vmem:[%s2056_s1 + $0x2b0] sm:$0xff] }
  0x61   :  { %948 = vmatprep.mubr.msk.bf16.mxu1 %vm514_vm0, %v457_v31  ;;  %v416_v31 = vld [vmem:[%s2056_s1 + $0x2f0] sm:$0xff]  ;;  %v494_v35 = vpack.c.bf16 %v414_v29, %v406_v28 }
  0x62   :  { %v496_v36 = vpack.c.bf16 %v416_v31, %v408_v30 }
  0x67   :  { %766 = vmatmul.mubr.bf16.vlgmr.msra.gmra.mrb[32].mxu0 %v454_v39  ;;  %v422_v39 = vld [vmem:[%s2056_s1 + $0x320] sm:$0xff] }
  0x68   :  { %863 = vmatmul.mubr.bf16.vlgmr.msra.gmra.mrb[32].mxu1 %v456_v40  ;;  %773 = vmatprep.mubr.bf16.mxu0 %v463_v41  ;;  %v430_v40 = vld [vmem:[%s2056_s1 + $0x360] sm:$0xff]  ;;  %v424_v41 = vld [vmem:[%s2056_s1 + $0x330] sm:$0xff] }
  0x69   :  { %949 = vmatprep.mubr.msk.bf16.mxu1 %vm514_vm0, %v465_v42  ;;  %v432_v42 = vld [vmem:[%s2056_s1 + $0x370] sm:$0xff]  ;;  %v502_v47 = vpack.c.bf16 %v430_v40, %v422_v39 }
  0x6a   :  { %v504_v48 = vpack.c.bf16 %v432_v42, %v424_v41 }
  0x6f   :  { %774 = vmatmul.mubr.bf16.gmra.mrb[36].mxu0 %v462_v51  ;;  %v438_v51 = vld [vmem:[%s2056_s1 + $0x3a0] sm:$0xff] }
  0x70   :  { %871 = vmatmul.mubr.bf16.gmra.mrb[36].mxu1 %v464_v52  ;;  %781 = vmatprep.mubr.bf16.mxu0 %v471_v53  ;;  %v446_v52 = vld [vmem:[%s2056_s1 + $0x3e0] sm:$0xff]  ;;  %v440_v53 = vld [vmem:[%s2056_s1 + $0x3b0] sm:$0xff] }
  0x71   :  { %950 = vmatprep.mubr.msk.bf16.mxu1 %vm514_vm0, %v473_v54  ;;  %v448_v54 = vld [vmem:[%s2056_s1 + $0x3f0] sm:$0xff]  ;;  %v510_v55 = vpack.c.bf16 %v446_v52, %v438_v51 }
  0x72   :  { %v512_v56 = vpack.c.bf16 %v448_v54, %v440_v53 }
  0x77   :  { %782 = vmatmul.mubr.bf16.gmra.mrb[40].mxu0 %v470_v63 }
  0x78   :  { %879 = vmatmul.mubr.bf16.gmra.mrb[40].mxu1 %v472_v0  ;;  %789 = vmatprep.mubr.bf16.mxu0 %v479_v1 }
  0x79   :  { %951 = vmatprep.mubr.msk.bf16.mxu1 %vm514_vm0, %v481_v2 }
  0x7f   :  { %790 = vmatmul.mubr.bf16.gmra.mrb[44].mxu0 %v478_v11 }
  0x80   :  { %887 = vmatmul.mubr.bf16.gmra.mrb[44].mxu1 %v480_v12  ;;  %797 = vmatprep.mubr.bf16.mxu0 %v487_v13 }
  0x81   :  { %952 = vmatprep.mubr.msk.bf16.mxu1 %vm514_vm0, %v489_v14 }
  0x87   :  { %798 = vmatmul.mubr.bf16.gmra.mrb[48].mxu0 %v486_v24 }
  0x88   :  { %895 = vmatmul.mubr.bf16.gmra.mrb[48].mxu1 %v488_v25  ;;  %805 = vmatprep.mubr.bf16.mxu0 %v495_v26 }
  0x89   :  { %953 = vmatprep.mubr.msk.bf16.mxu1 %vm514_vm0, %v497_v27 }
  0x8f   :  { %806 = vmatmul.mubr.bf16.gmra.mrb[52].mxu0 %v494_v35 }
  0x90   :  { %903 = vmatmul.mubr.bf16.gmra.mrb[52].mxu1 %v496_v36  ;;  %813 = vmatprep.mubr.bf16.mxu0 %v503_v37 }
  0x91   :  { %954 = vmatprep.mubr.msk.bf16.mxu1 %vm514_vm0, %v505_v38 }
  0x97   :  { %814 = vmatmul.mubr.bf16.gmra.mrb[56].mxu0 %v502_v47 }
  0x98   :  { %911 = vmatmul.mubr.bf16.gmra.mrb[56].mxu1 %v504_v48  ;;  %821 = vmatprep.mubr.bf16.mxu0 %v511_v49 }
  0x99   :  { %955 = vmatprep.mubr.msk.bf16.mxu1 %vm514_vm0, %v513_v50 }
  0x9f   :  { %822 = vmatmul.mubr.bf16.gmra.mrb[60].mxu0 %v510_v55 }
  0xa0   :  { %919 = vmatmul.mubr.bf16.gmra.mrb[60].mxu1 %v512_v56 }
  0xfa   :  { %v972_v57 = vpop.f32.mrb[0].mxu0 }
  0xfb   :  { %v1036_v58 = vpop.f32.mrb[0].mxu1  ;;  %v973_v59 = vpop.f32.mrb[1].mxu0 }
  0xfc   :  { %v974_v60 = vadd.f32 %v973_v59, %v972_v57  ;;  %v1037_v61 = vpop.f32.mrb[1].mxu1  ;;  %v975_v62 = vpop.f32.mrb[2].mxu0 }
  0xfd   :  { %v1038_v63 = vadd.f32 %v1037_v61, %v1036_v58  ;;  %v1039_v0 = vpop.f32.mrb[2].mxu1  ;;  %v976_v1 = vpop.f32.mrb[3].mxu0 }
  0xfe   :  { %v977_v2 = vadd.f32 %v976_v1, %v975_v62  ;;  %v1040_v3 = vpop.f32.mrb[3].mxu1 }
  0xff   :  { %v1943_v4 = vadd.f32 %v1038_v63, %v974_v60  ;;  %v1041_v5 = vadd.f32 %v1040_v3, %v1039_v0 }
 0x101   :  { %v1945_v6 = vadd.f32 %v1041_v5, %v977_v2 }
 0x102   :  { %v978_v7 = vpop.f32.mrb[4].mxu0 }
 0x103   :  { %v1042_v8 = vpop.f32.mrb[4].mxu1  ;;  %v979_v9 = vpop.f32.mrb[5].mxu0 }
 0x104   :  { %v980_v10 = vadd.f32 %v979_v9, %v978_v7  ;;  %v1043_v11 = vpop.f32.mrb[5].mxu1  ;;  %v981_v12 = vpop.f32.mrb[6].mxu0 }
 0x105   :  { %v1044_v13 = vadd.f32 %v1043_v11, %v1042_v8  ;;  %v1045_v14 = vpop.f32.mrb[6].mxu1  ;;  %v982_v15 = vpop.f32.mrb[7].mxu0 }
 0x106   :  { %v983_v17 = vadd.f32 %v982_v15, %v981_v12  ;;  %v1046_v18 = vpop.f32.mrb[7].mxu1 }
 0x107   :  { %v1947_v19 = vadd.f32 %v1044_v13, %v980_v10  ;;  %v1047_v20 = vadd.f32 %v1046_v18, %v1045_v14 }
 0x109   :  { %v1949_v21 = vadd.f32 %v1047_v20, %v983_v17 }
 0x10a   :  { %v984_v22 = vpop.f32.mrb[8].mxu0 }
 0x10b   :  { %v1048_v23 = vpop.f32.mrb[8].mxu1  ;;  %v985_v24 = vpop.f32.mrb[9].mxu0 }
 0x10c   :  { %v986_v25 = vadd.f32 %v985_v24, %v984_v22  ;;  %v1049_v26 = vpop.f32.mrb[9].mxu1  ;;  %v987_v27 = vpop.f32.mrb[10].mxu0 }
 0x10d   :  { %v1050_v28 = vadd.f32 %v1049_v26, %v1048_v23  ;;  %v1051_v29 = vpop.f32.mrb[10].mxu1  ;;  %v988_v30 = vpop.f32.mrb[11].mxu0 }
 0x10e   :  { %v989_v31 = vadd.f32 %v988_v30, %v987_v27  ;;  %v1052_v16 = vpop.f32.mrb[11].mxu1 }
 0x10f   :  { %v1951_v32 = vadd.f32 %v1050_v28, %v986_v25  ;;  %v1053_v33 = vadd.f32 %v1052_v16, %v1051_v29 }
 0x111   :  { %v1953_v34 = vadd.f32 %v1053_v33, %v989_v31 }
 0x112   :  { %v990_v35 = vpop.f32.mrb[12].mxu0 }
 0x113   :  { %v1054_v36 = vpop.f32.mrb[12].mxu1  ;;  %v991_v37 = vpop.f32.mrb[13].mxu0 }
 0x114   :  { %v992_v38 = vadd.f32 %v991_v37, %v990_v35  ;;  %v1055_v39 = vpop.f32.mrb[13].mxu1  ;;  %v993_v40 = vpop.f32.mrb[14].mxu0 }
 0x115   :  { %v1056_v41 = vadd.f32 %v1055_v39, %v1054_v36  ;;  %v1057_v42 = vpop.f32.mrb[14].mxu1  ;;  %v994_v43 = vpop.f32.mrb[15].mxu0 }
 0x116   :  { %v995_v44 = vadd.f32 %v994_v43, %v993_v40  ;;  %v1058_v45 = vpop.f32.mrb[15].mxu1 }
 0x117   :  { %v1955_v46 = vadd.f32 %v1056_v41, %v992_v38  ;;  %v1059_v47 = vadd.f32 %v1058_v45, %v1057_v42 }
 0x119   :  { %v1957_v48 = vadd.f32 %v1059_v47, %v995_v44 }
 0x11a   :  { %v996_v49 = vpop.f32.mrb[16].mxu0 }
 0x11b   :  { %v1060_v50 = vpop.f32.mrb[16].mxu1  ;;  %v997_v51 = vpop.f32.mrb[17].mxu0 }
 0x11c   :  { %v998_v52 = vadd.f32 %v997_v51, %v996_v49  ;;  %v1061_v53 = vpop.f32.mrb[17].mxu1  ;;  %v999_v54 = vpop.f32.mrb[18].mxu0 }
 0x11d   :  { %v1062_v55 = vadd.f32 %v1061_v53, %v1060_v50  ;;  %v1063_v56 = vpop.f32.mrb[18].mxu1  ;;  %v1000_v57 = vpop.f32.mrb[19].mxu0 }
 0x11e   :  { %v1001_v58 = vadd.f32 %v1000_v57, %v999_v54  ;;  %v1064_v59 = vpop.f32.mrb[19].mxu1 }
 0x11f   :  { %v1959_v60 = vadd.f32 %v1062_v55, %v998_v52  ;;  %v1065_v61 = vadd.f32 %v1064_v59, %v1063_v56 }
 0x121   :  { %v1961_v62 = vadd.f32 %v1065_v61, %v1001_v58 }
 0x122   :  { %v1002_v63 = vpop.f32.mrb[20].mxu0 }
 0x123   :  { %v1066_v0 = vpop.f32.mrb[20].mxu1  ;;  %v1003_v1 = vpop.f32.mrb[21].mxu0 }
 0x124   :  { %v1004_v2 = vadd.f32 %v1003_v1, %v1002_v63  ;;  %v1067_v3 = vpop.f32.mrb[21].mxu1  ;;  %v1005_v5 = vpop.f32.mrb[22].mxu0 }
 0x125   :  { %v1068_v7 = vadd.f32 %v1067_v3, %v1066_v0  ;;  %v1069_v8 = vpop.f32.mrb[22].mxu1  ;;  %v1006_v9 = vpop.f32.mrb[23].mxu0 }
 0x126   :  { %v1007_v10 = vadd.f32 %v1006_v9, %v1005_v5  ;;  %v1070_v11 = vpop.f32.mrb[23].mxu1 }
 0x127   :  { %v1963_v12 = vadd.f32 %v1068_v7, %v1004_v2  ;;  %v1071_v13 = vadd.f32 %v1070_v11, %v1069_v8 }
 0x129   :  { %v1965_v14 = vadd.f32 %v1071_v13, %v1007_v10 }
 0x12a   :  { %v1008_v15 = vpop.f32.mrb[24].mxu0 }
 0x12b   :  { %v1072_v17 = vpop.f32.mrb[24].mxu1  ;;  %v1009_v18 = vpop.f32.mrb[25].mxu0 }
 0x12c   :  { %v1010_v20 = vadd.f32 %v1009_v18, %v1008_v15  ;;  %v1073_v22 = vpop.f32.mrb[25].mxu1  ;;  %v1011_v23 = vpop.f32.mrb[26].mxu0 }
 0x12d   :  { %v1074_v24 = vadd.f32 %v1073_v22, %v1072_v17  ;;  %v1075_v25 = vpop.f32.mrb[26].mxu1  ;;  %v1012_v26 = vpop.f32.mrb[27].mxu0 }
 0x12e   :  { %v1013_v27 = vadd.f32 %v1012_v26, %v1011_v23  ;;  %v1076_v28 = vpop.f32.mrb[27].mxu1 }
 0x12f   :  { %v1967_v29 = vadd.f32 %v1074_v24, %v1010_v20  ;;  %v1077_v30 = vadd.f32 %v1076_v28, %v1075_v25 }
 0x131   :  { %v1969_v31 = vadd.f32 %v1077_v30, %v1013_v27 }
 0x132   :  { %v1014_v16 = vpop.f32.mrb[28].mxu0 }
 0x133   :  { %v1078_v33 = vpop.f32.mrb[28].mxu1  ;;  %v1015_v35 = vpop.f32.mrb[29].mxu0 }
 0x134   :  { %v1016_v36 = vadd.f32 %v1015_v35, %v1014_v16  ;;  %v1079_v37 = vpop.f32.mrb[29].mxu1  ;;  %v1017_v38 = vpop.f32.mrb[30].mxu0 }
 0x135   :  { %v1080_v39 = vadd.f32 %v1079_v37, %v1078_v33  ;;  %v1081_v40 = vpop.f32.mrb[30].mxu1  ;;  %v1018_v41 = vpop.f32.mrb[31].mxu0 }
 0x136   :  { %v1019_v42 = vadd.f32 %v1018_v41, %v1017_v38  ;;  %v1082_v43 = vpop.f32.mrb[31].mxu1 }
 0x137   :  { %v1971_v44 = vadd.f32 %v1080_v39, %v1016_v36  ;;  %v1083_v45 = vadd.f32 %v1082_v43, %v1081_v40 }
 0x139   :  { %v1973_v47 = vadd.f32 %v1083_v45, %v1019_v42 }
 0x13a   :  { %v1100_v49 = vpop.f32.mrb[32].mxu0 }
 0x13b   :  { %v1101_v50 = vpop.f32.mrb[33].mxu0  ;;  %v864_v51 = vpop.f32.mrb[32].mxu1 }
 0x13c   :  { %v1102_v52 = vadd.f32 %v1101_v50, %v1100_v49  ;;  %v1103_v53 = vpop.f32.mrb[34].mxu0  ;;  %v866_v54 = vpop.f32.mrb[33].mxu1 }
 0x13d   :  { %v1104_v55 = vpop.f32.mrb[35].mxu0  ;;  %v867_v56 = vpop.f32.mrb[34].mxu1 }
 0x13e   :  { %v1105_v57 = vadd.f32 %v1104_v55, %v1103_v53  ;;  %v768_v58 = vadd.f32 %v1102_v52, %v1943_v4  ;;  %v869_v59 = vpop.f32.mrb[35].mxu1 }
 0x140   :  { %v865_v61 = vadd.f32 %v864_v51, %v768_v58  ;;  %v771_v63 = vadd.f32 %v1105_v57, %v1945_v6 }
 0x142   :  { %928 = vst.msk [vmem:[%s2057_s2] sm:$0xff] %vm927_vm1, %v865_v61  ;;  %v868_v0 = vadd.f32 %v867_v56, %v771_v63  ;;  %v1106_v1 = vpop.f32.mrb[36].mxu0 }
 0x143   :  { %v1107_v2 = vpop.f32.mrb[37].mxu0  ;;  %v872_v3 = vpop.f32.mrb[36].mxu1 }
 0x144   :  { %929 = vst.msk [vmem:[%s2057_s2 + $0x8] sm:$0xff] %vm927_vm1, %v868_v0  ;;  %v1108_v4 = vadd.f32 %v1107_v2, %v1106_v1  ;;  %v1109_v5 = vpop.f32.mrb[38].mxu0  ;;  %v874_v7 = vpop.f32.mrb[37].mxu1 }
 0x145   :  { %v1110_v8 = vpop.f32.mrb[39].mxu0  ;;  %v875_v9 = vpop.f32.mrb[38].mxu1 }
 0x146   :  { %v1111_v6 = vadd.f32 %v1110_v8, %v1109_v5  ;;  %v776_v10 = vadd.f32 %v1108_v4, %v1947_v19  ;;  %v877_v11 = vpop.f32.mrb[39].mxu1 }
 0x148   :  { %v873_v13 = vadd.f32 %v872_v3, %v776_v10  ;;  %v779_v15 = vadd.f32 %v1111_v6, %v1949_v21 }
 0x14a   :  { %930 = vst.msk [vmem:[%s2057_s2 + $0x10] sm:$0xff] %vm927_vm1, %v873_v13  ;;  %v876_v17 = vadd.f32 %v875_v9, %v779_v15  ;;  %v1112_v18 = vpop.f32.mrb[40].mxu0 }
 0x14b   :  { %v1113_v20 = vpop.f32.mrb[41].mxu0  ;;  %v880_v22 = vpop.f32.mrb[40].mxu1 }
 0x14c   :  { %931 = vst.msk [vmem:[%s2057_s2 + $0x18] sm:$0xff] %vm927_vm1, %v876_v17  ;;  %v1114_v23 = vadd.f32 %v1113_v20, %v1112_v18  ;;  %v1115_v19 = vpop.f32.mrb[42].mxu0  ;;  %v882_v24 = vpop.f32.mrb[41].mxu1 }
 0x14d   :  { %v1116_v25 = vpop.f32.mrb[43].mxu0  ;;  %v883_v26 = vpop.f32.mrb[42].mxu1 }
 0x14e   :  { %v1117_v21 = vadd.f32 %v1116_v25, %v1115_v19  ;;  %v784_v27 = vadd.f32 %v1114_v23, %v1951_v32  ;;  %v885_v28 = vpop.f32.mrb[43].mxu1 }
 0x150   :  { %v881_v30 = vadd.f32 %v880_v22, %v784_v27  ;;  %v787_v16 = vadd.f32 %v1117_v21, %v1953_v34 }
 0x152   :  { %932 = vst.msk [vmem:[%s2057_s2 + $0x20] sm:$0xff] %vm927_vm1, %v881_v30  ;;  %v884_v33 = vadd.f32 %v883_v26, %v787_v16  ;;  %v1118_v35 = vpop.f32.mrb[44].mxu0 }
 0x153   :  { %v1119_v36 = vpop.f32.mrb[45].mxu0  ;;  %v888_v37 = vpop.f32.mrb[44].mxu1 }
 0x154   :  { %933 = vst.msk [vmem:[%s2057_s2 + $0x28] sm:$0xff] %vm927_vm1, %v884_v33  ;;  %v1120_v38 = vadd.f32 %v1119_v36, %v1118_v35  ;;  %v1121_v32 = vpop.f32.mrb[46].mxu0  ;;  %v890_v39 = vpop.f32.mrb[45].mxu1 }
 0x155   :  { %v1122_v40 = vpop.f32.mrb[47].mxu0  ;;  %v891_v41 = vpop.f32.mrb[46].mxu1 }
 0x156   :  { %v1123_v34 = vadd.f32 %v1122_v40, %v1121_v32  ;;  %v792_v42 = vadd.f32 %v1120_v38, %v1955_v46  ;;  %v893_v43 = vpop.f32.mrb[47].mxu1 }
 0x158   :  { %v889_v45 = vadd.f32 %v888_v37, %v792_v42  ;;  %v795_v49 = vadd.f32 %v1123_v34, %v1957_v48 }
 0x15a   :  { %934 = vst.msk [vmem:[%s2057_s2 + $0x30] sm:$0xff] %vm927_vm1, %v889_v45  ;;  %v892_v50 = vadd.f32 %v891_v41, %v795_v49  ;;  %v1124_v51 = vpop.f32.mrb[48].mxu0 }
 0x15b   :  { %v1125_v52 = vpop.f32.mrb[49].mxu0  ;;  %v896_v53 = vpop.f32.mrb[48].mxu1 }
 0x15c   :  { %935 = vst.msk [vmem:[%s2057_s2 + $0x38] sm:$0xff] %vm927_vm1, %v892_v50  ;;  %v1126_v54 = vadd.f32 %v1125_v52, %v1124_v51  ;;  %v1127_v46 = vpop.f32.mrb[50].mxu0  ;;  %v898_v55 = vpop.f32.mrb[49].mxu1 }
 0x15d   :  { %v1128_v56 = vpop.f32.mrb[51].mxu0  ;;  %v899_v57 = vpop.f32.mrb[50].mxu1 }
 0x15e   :  { %v1129_v48 = vadd.f32 %v1128_v56, %v1127_v46  ;;  %v800_v58 = vadd.f32 %v1126_v54, %v1959_v60  ;;  %v901_v59 = vpop.f32.mrb[51].mxu1 }
 0x160   :  { %v897_v61 = vadd.f32 %v896_v53, %v800_v58  ;;  %v803_v63 = vadd.f32 %v1129_v48, %v1961_v62 }
 0x162   :  { %936 = vst.msk [vmem:[%s2057_s2 + $0x40] sm:$0xff] %vm927_vm1, %v897_v61  ;;  %v900_v0 = vadd.f32 %v899_v57, %v803_v63  ;;  %v1130_v1 = vpop.f32.mrb[52].mxu0 }
 0x163   :  { %v1131_v2 = vpop.f32.mrb[53].mxu0  ;;  %v904_v3 = vpop.f32.mrb[52].mxu1 }
 0x164   :  { %937 = vst.msk [vmem:[%s2057_s2 + $0x48] sm:$0xff] %vm927_vm1, %v900_v0  ;;  %v1132_v4 = vadd.f32 %v1131_v2, %v1130_v1  ;;  %v1133_v60 = vpop.f32.mrb[54].mxu0  ;;  %v906_v5 = vpop.f32.mrb[53].mxu1 }
 0x165   :  { %v1134_v7 = vpop.f32.mrb[55].mxu0  ;;  %v907_v8 = vpop.f32.mrb[54].mxu1 }
 0x166   :  { %v1135_v62 = vadd.f32 %v1134_v7, %v1133_v60  ;;  %v808_v9 = vadd.f32 %v1132_v4, %v1963_v12  ;;  %v909_v6 = vpop.f32.mrb[55].mxu1 }
 0x168   :  { %v905_v10 = vadd.f32 %v904_v3, %v808_v9  ;;  %v811_v11 = vadd.f32 %v1135_v62, %v1965_v14 }
 0x16a   :  { %938 = vst.msk [vmem:[%s2057_s2 + $0x50] sm:$0xff] %vm927_vm1, %v905_v10  ;;  %v908_v13 = vadd.f32 %v907_v8, %v811_v11  ;;  %v1136_v15 = vpop.f32.mrb[56].mxu0 }
 0x16b   :  { %v1137_v17 = vpop.f32.mrb[57].mxu0  ;;  %v912_v18 = vpop.f32.mrb[56].mxu1 }
 0x16c   :  { %939 = vst.msk [vmem:[%s2057_s2 + $0x58] sm:$0xff] %vm927_vm1, %v908_v13  ;;  %v1138_v20 = vadd.f32 %v1137_v17, %v1136_v15  ;;  %v1139_v12 = vpop.f32.mrb[58].mxu0  ;;  %v914_v22 = vpop.f32.mrb[57].mxu1 }
 0x16d   :  { %v1140_v23 = vpop.f32.mrb[59].mxu0  ;;  %v915_v19 = vpop.f32.mrb[58].mxu1 }
 0x16e   :  { %v1141_v14 = vadd.f32 %v1140_v23, %v1139_v12  ;;  %v816_v24 = vadd.f32 %v1138_v20, %v1967_v29  ;;  %v917_v25 = vpop.f32.mrb[59].mxu1 }
 0x170   :  { %v913_v26 = vadd.f32 %v912_v18, %v816_v24  ;;  %v819_v21 = vadd.f32 %v1141_v14, %v1969_v31 }
 0x172   :  { %940 = vst.msk [vmem:[%s2057_s2 + $0x60] sm:$0xff] %vm927_vm1, %v913_v26  ;;  %v916_v27 = vadd.f32 %v915_v19, %v819_v21  ;;  %v1142_v28 = vpop.f32.mrb[60].mxu0 }
 0x173   :  { %v1143_v30 = vpop.f32.mrb[61].mxu0  ;;  %v920_v16 = vpop.f32.mrb[60].mxu1 }
 0x174   :  { %941 = vst.msk [vmem:[%s2057_s2 + $0x68] sm:$0xff] %vm927_vm1, %v916_v27  ;;  %v1144_v33 = vadd.f32 %v1143_v30, %v1142_v28  ;;  %v1145_v29 = vpop.f32.mrb[62].mxu0  ;;  %v922_v35 = vpop.f32.mrb[61].mxu1 }
 0x175   :  { %v1146_v36 = vpop.f32.mrb[63].mxu0  ;;  %v923_v37 = vpop.f32.mrb[62].mxu1 }
 0x176   :  { %v1147_v31 = vadd.f32 %v1146_v36, %v1145_v29  ;;  %v824_v38 = vadd.f32 %v1144_v33, %v1971_v44  ;;  %v925_v32 = vpop.f32.mrb[63].mxu1 }
 0x178   :  { %v921_v39 = vadd.f32 %v920_v16, %v824_v38  ;;  %v827_v40 = vadd.f32 %v1147_v31, %v1973_v47 }
 0x17a   :  { %942 = vst.msk [vmem:[%s2057_s2 + $0x70] sm:$0xff] %vm927_vm1, %v921_v39  ;;  %v924_v41 = vadd.f32 %v923_v37, %v827_v40 }
 0x17c   :  { %943 = vst.msk [vmem:[%s2057_s2 + $0x78] sm:$0xff] %vm927_vm1, %v924_v41 }

</bundles_post_ra>
